<compile_context>
chip_gen: v6e
topology: v6e:2x2x1
jax: 0.10.0
libtpu: 0.0.40
codegen_flags: <defaults>
</compile_context>

<pallas_src>
import functools
import math

import jax
import jax.numpy as jnp
from jax import lax
from jax.experimental import pallas as pl
from jax.experimental.pallas import tpu as pltpu


def _round_up(n: int, m: int) -> int:
    return ((n + m - 1) // m) * m


def _attention_kernel(x_ref, wqkv_ref, o_ref, *, d_out_p, mxu_dtype):
    # x_ref:    (Bt, seq, d_in)
    # wqkv_ref: (d_in, 3*d_out_p)   -- [W_query*scale | W_key | W_value], padded
    # o_ref:    (Bt, seq, d_out_p)
    bt = x_ref.shape[0]

    w = wqkv_ref[...]
    if w.dtype != mxu_dtype:            # cast only when a narrower MXU dtype is requested
        w = w.astype(mxu_dtype)

    # Static unroll over the Bt sequences in this block (tiny trip count).
    for i in range(bt):
        x = x_ref[i]                    # (seq, d_in)
        if x.dtype != mxu_dtype:
            x = x.astype(mxu_dtype)

        # Fused QKV projection: one MXU matmul instead of three.
        qkv = jnp.dot(x, w, preferred_element_type=jnp.float32)  # (seq, 3*d_out_p)

        q = qkv[:, :d_out_p]                      # 1/sqrt(d_k) already folded into W_query
        k = qkv[:, d_out_p:2 * d_out_p]
        v = qkv[:, 2 * d_out_p:]

        # scores = q @ k.T without materializing a transpose: contract dim 1
        # of q with dim 1 of k directly on the MXU.
        scores = lax.dot_general(
            q.astype(mxu_dtype),
            k.astype(mxu_dtype),
            dimension_numbers=(((1,), (1,)), ((), ())),
            preferred_element_type=jnp.float32,
        )

        # Numerically stable softmax; all vector math stays in f32.
        m = jnp.max(scores, axis=-1, keepdims=True)
        p = jnp.exp(scores - m)
        l = jnp.sum(p, axis=-1, keepdims=True)

        # PV first, normalize after (O(seq*d_out) instead of O(seq^2) multiply).
        ctx = jnp.dot(
            p.astype(mxu_dtype),
            v.astype(mxu_dtype),
            preferred_element_type=jnp.float32,
        )
        inv = pl.reciprocal(l, approx=True)       # EUP slot, effectively free
        inv = inv * (2.0 - l * inv)               # one Newton step -> ~f32-exact
        o_ref[i] = (ctx * inv).astype(o_ref.dtype)


def self_attention_v1(x, w_query, w_key, w_value, *, compute_dtype=None, block_b=8):
    """SelfAttention_v1 forward. x: (seq, d_in) or (B, seq, d_in). Returns f32."""
    squeeze_batch = x.ndim == 2
    if squeeze_batch:
        x = x[None]
    b, seq, d_in = x.shape
    d_out = w_query.shape[1]
    scale = 1.0 / math.sqrt(float(d_out))          # d_k = keys.shape[1] = d_out

    # Lane-dense padding of each weight to 128 output columns, scale folded
    # into W_query, and concatenation into a single fused QKV weight slab.
    d_out_p = _round_up(d_out, 128)
    pad = ((0, 0), (0, d_out_p - d_out))
    wqkv = jnp.concatenate(
        [jnp.pad(w_query * scale, pad), jnp.pad(w_key, pad), jnp.pad(w_value, pad)],
        axis=1,
    )  # (d_in, 3*d_out_p)

    # Batch tiling: Bt sequences per grid step (pad batch to a multiple of Bt).
    bt = max(1, min(b, block_b))
    b_pad = _round_up(b, bt)
    if b_pad != b:
        x = jnp.pad(x, ((0, b_pad - b), (0, 0), (0, 0)))

    mxu_dtype = jnp.dtype(compute_dtype) if compute_dtype is not None else jnp.dtype(x.dtype)
    kernel = functools.partial(_attention_kernel, d_out_p=d_out_p, mxu_dtype=mxu_dtype)

    # Advisory cost estimate with the REAL d_out (padding is not real work).
    flops = int(b * (3 * 2 * seq * d_in * d_out        # fused QKV projection
                     + 2 * seq * seq * d_out           # Q @ K^T
                     + 2 * seq * seq * d_out))         # attn @ V
    transcendentals = int(b * seq * seq)               # exp in softmax
    bytes_accessed = int(x.size * x.dtype.itemsize
                         + 3 * d_in * d_out * 4
                         + b * seq * d_out * 4)

    vmem = pltpu.MemorySpace.VMEM
    x_spec = pl.BlockSpec((bt, seq, d_in), lambda i: (i, 0, 0), memory_space=vmem)
    out_spec = pl.BlockSpec((bt, seq, d_out_p), lambda i: (i, 0, 0), memory_space=vmem)
    # TODO(synk): on v7x, consider pltpu.CORE_PARALLEL on the batch axis if
    # "parallel" does not shard the grid across the 2 TensorCores.
    compiler_params = pltpu.CompilerParams(dimension_semantics=("parallel",))
    cost = pl.CostEstimate(flops=flops, transcendentals=transcendentals,
                           bytes_accessed=bytes_accessed)

    def _call(w_spec):
        return pl.pallas_call(
            kernel,
            out_shape=jax.ShapeDtypeStruct((b_pad, seq, d_out_p), jnp.float32),
            grid=(b_pad // bt,),
            in_specs=[x_spec, w_spec],
            out_specs=out_spec,
            compiler_params=compiler_params,
            cost_estimate=cost,
        )(x, wqkv)

    try:
        # Constant index_map -> single-buffer the weight to save VMEM.
        out = _call(pl.BlockSpec((d_in, 3 * d_out_p), lambda i: (0, 0),
                                 memory_space=vmem, pipeline_mode=pl.Buffered(1)))
    except Exception:
        # Fallback: default (double-buffered) weight spec.
        out = _call(pl.BlockSpec((d_in, 3 * d_out_p), lambda i: (0, 0),
                                 memory_space=vmem))

    # Drop padded batch rows and zero-padded output lanes.
    out = out[:b, :, :d_out]
    if squeeze_batch:
        out = out[0]
    return out


def _reference(x, wq, wk, wv):
    q = x @ wq
    k = x @ wk
    v = x @ wv
    scores = jnp.einsum("...qd,...kd->...qk", q, k) / (wq.shape[1] ** 0.5)
    w = jax.nn.softmax(scores, axis=-1)
    return jnp.einsum("...qk,...kd->...qd", w, v)


if __name__ == "__main__":
    # Same tokens as the PyTorch script (seq=6, d_in=3, d_out=2).
    x = jnp.array(
        [[0.43, 0.15, 0.89],
         [0.55, 0.87, 0.66],
         [0.57, 0.85, 0.64],
         [0.22, 0.58, 0.33],
         [0.77, 0.25, 0.10],
         [0.05, 0.80, 0.55]],
        dtype=jnp.float32,
    )
    d_in, d_out = 3, 2

    # Deterministic parameter init (stand-in for torch.randn).
    key = jax.random.PRNGKey(0)
    kq, kk, kv, kb = jax.random.split(key, 4)
    w_query = jax.random.normal(kq, (d_in, d_out), dtype=jnp.float32)
    w_key = jax.random.normal(kk, (d_in, d_out), dtype=jnp.float32)
    w_value = jax.random.normal(kv, (d_in, d_out), dtype=jnp.float32)

    # 1) Exact spec shapes: one (6, 3) sequence.
    ctx = jax.block_until_ready(self_attention_v1(x, w_query, w_key, w_value))
    ref = _reference(x, w_query, w_key, w_value)
    assert ctx.shape == (6, 2), ctx.shape
    assert jnp.allclose(ctx, ref, atol=1e-4, rtol=1e-4), (ctx, ref)

    # 2) Batched: 8 sequences in one grid step (batch block = 8).
    B = 8
    xb = jax.random.normal(kb, (B, 6, d_in), dtype=jnp.float32)
    ctxb = jax.block_until_ready(self_attention_v1(xb, w_query, w_key, w_value))
    refb = _reference(xb, w_query, w_key, w_value)
    assert ctxb.shape == (B, 6, 2), ctxb.shape
    assert jnp.allclose(ctxb, refb, atol=1e-4, rtol=1e-4), (ctxb, refb)

    # 3) Batch not a multiple of the block: exercises batch padding + 2 grid steps.
    B2 = 12
    xb2 = jax.random.normal(jax.random.PRNGKey(1), (B2, 6, d_in), dtype=jnp.float32)
    ctxb2 = jax.block_until_ready(self_attention_v1(xb2, w_query, w_key, w_value))
    refb2 = _reference(xb2, w_query, w_key, w_value)
    assert ctxb2.shape == (B2, 6, 2), ctxb2.shape
    assert jnp.allclose(ctxb2, refb2, atol=1e-4, rtol=1e-4), (ctxb2, refb2)

    # 4) Opt-in bf16 MXU operands (v6e/v7x path); looser tolerance is the
    #    expected bf16 precision loss, softmax math is still f32.
    ctx_bf16 = jax.block_until_ready(
        self_attention_v1(xb, w_query, w_key, w_value, compute_dtype=jnp.bfloat16))
    assert ctx_bf16.shape == (B, 6, 2), ctx_bf16.shape
    assert jnp.allclose(ctx_bf16, refb, atol=1e-1, rtol=1e-1), (ctx_bf16, refb)

    print("KERNEL_OK")
</pallas_src>

<mosaic_0001>
module attributes {stable_mosaic.version = 11 : i64} {
  func.func @_attention_kernel(%arg0: i32, %arg1: memref<1x6x3xf32, #tpu.memory_space<vmem>>, %arg2: memref<3x384xf32, #tpu.memory_space<vmem>>, %arg3: memref<1x6x128xf32, #tpu.memory_space<vmem>>) attributes {dimension_semantics = [#tpu.dimension_semantics<parallel>], iteration_bounds = array<i64: 1>, scalar_prefetch = 0 : i64, scratch_operands = 0 : i64, tpu.core_type = #tpu.core_type<tc>, window_params = [{transform_indices = @transform_0, window_bounds = array<i64: 1, 6, 3>}, {pipeline_mode = #tpu.pipeline_mode<synchronous>, transform_indices = @transform_1, window_bounds = array<i64: 3, 384>}, {transform_indices = @transform_2, window_bounds = array<i64: 1, 6, 128>}]} {
    %c0 = arith.constant 0 : index
    %c0_0 = arith.constant 0 : index
    %0 = vector.load %arg2[%c0, %c0_0] : memref<3x384xf32, #tpu.memory_space<vmem>>, vector<3x384xf32>
    %c0_1 = arith.constant 0 : index
    %c0_2 = arith.constant 0 : index
    %c0_3 = arith.constant 0 : index
    %1 = vector.load %arg1[%c0_1, %c0_2, %c0_3] : memref<1x6x3xf32, #tpu.memory_space<vmem>>, vector<1x6x3xf32>
    %2 = vector.shape_cast %1 : vector<1x6x3xf32> to vector<6x3xf32>
    %cst = arith.constant dense<0.000000e+00> : vector<6x384xf32>
    %3 = tpu.matmul %2, %0, %cst {dimension_numbers = #tpu.dot_dimension_numbers<[1], [0], [0], [1], [0, 0, 1, 1], [], []>} : vector<6x3xf32>, vector<3x384xf32>, vector<6x384xf32> -> vector<6x384xf32>
    %4 = vector.extract_strided_slice %3 {offsets = [0, 0], sizes = [6, 128], strides = [1, 1]} : vector<6x384xf32> to vector<6x128xf32>
    %5 = vector.extract_strided_slice %3 {offsets = [0, 128], sizes = [6, 128], strides = [1, 1]} : vector<6x384xf32> to vector<6x128xf32>
    %6 = vector.extract_strided_slice %3 {offsets = [0, 256], sizes = [6, 128], strides = [1, 1]} : vector<6x384xf32> to vector<6x128xf32>
    %cst_4 = arith.constant dense<0.000000e+00> : vector<6x6xf32>
    %7 = tpu.matmul %4, %5, %cst_4 {dimension_numbers = #tpu.dot_dimension_numbers<[1], [1], [0], [0], [0, 0, 1, 0], [], []>} : vector<6x128xf32>, vector<6x128xf32>, vector<6x6xf32> -> vector<6x6xf32>
    %cst_5 = arith.constant dense<0xFF800000> : vector<6xf32>
    %8 = vector.multi_reduction <maximumf>, %7, %cst_5 [1] : vector<6x6xf32> to vector<6xf32>
    %9 = vector.shape_cast %8 : vector<6xf32> to vector<6x1xf32>
    %10 = vector.broadcast %9 : vector<6x1xf32> to vector<6x6xf32>
    %11 = arith.subf %7, %10 : vector<6x6xf32>
    %12 = math.exp %11 : vector<6x6xf32>
    %cst_6 = arith.constant dense<0.000000e+00> : vector<6xf32>
    %13 = vector.multi_reduction <add>, %12, %cst_6 [1] : vector<6x6xf32> to vector<6xf32>
    %14 = vector.shape_cast %13 : vector<6xf32> to vector<6x1xf32>
    %cst_7 = arith.constant dense<0.000000e+00> : vector<6x128xf32>
    %15 = tpu.matmul %12, %6, %cst_7 {dimension_numbers = #tpu.dot_dimension_numbers<[1], [0], [0], [1], [0, 0, 1, 1], [], []>} : vector<6x6xf32>, vector<6x128xf32>, vector<6x128xf32> -> vector<6x128xf32>
    %16 = tpu.reciprocal %14 {approx = true} : vector<6x1xf32> -> vector<6x1xf32>
    %17 = arith.mulf %14, %16 : vector<6x1xf32>
    %cst_8 = arith.constant 2.000000e+00 : f32
    %18 = vector.broadcast %cst_8 : f32 to vector<6x1xf32>
    %19 = arith.subf %18, %17 : vector<6x1xf32>
    %20 = arith.mulf %16, %19 : vector<6x1xf32>
    %21 = vector.broadcast %20 : vector<6x1xf32> to vector<6x128xf32>
    %22 = arith.mulf %15, %21 : vector<6x128xf32>
    %c0_9 = arith.constant 0 : index
    %c0_10 = arith.constant 0 : index
    %c0_11 = arith.constant 0 : index
    %23 = vector.load %arg3[%c0_9, %c0_10, %c0_11] : memref<1x6x128xf32, #tpu.memory_space<vmem>>, vector<1x6x128xf32>
    %24 = vector.shape_cast %23 : vector<1x6x128xf32> to vector<6x128xf32>
    %25 = vector.shape_cast %22 : vector<6x128xf32> to vector<1x6x128xf32>
    tpu.vector_store %arg3[%c0_9, %c0_10, %c0_11], %25 {strides = array<i32>} : memref<1x6x128xf32, #tpu.memory_space<vmem>>, vector<1x6x128xf32>,
    return
  }
  func.func @transform_0(%arg0: i32) -> (i32, i32, i32) {
    %c0_i32 = arith.constant 0 : i32
    %c0_i32_0 = arith.constant 0 : i32
    %c0_i32_1 = arith.constant 0 : i32
    return %arg0, %c0_i32, %c0_i32_0 : i32, i32, i32
  }
  func.func @transform_1(%arg0: i32) -> (i32, i32) {
    %c0_i32 = arith.constant 0 : i32
    %c0_i32_0 = arith.constant 0 : i32
    %c0_i32_1 = arith.constant 0 : i32
    return %c0_i32, %c0_i32_0 : i32, i32
  }
  func.func @transform_2(%arg0: i32) -> (i32, i32, i32) {
    %c0_i32 = arith.constant 0 : i32
    %c0_i32_0 = arith.constant 0 : i32
    %c0_i32_1 = arith.constant 0 : i32
    return %arg0, %c0_i32, %c0_i32_0 : i32, i32, i32
  }
}

module attributes {stable_mosaic.version = 11 : i64} {
  func.func @_attention_kernel(%arg0: i32, %arg1: memref<1x6x3xf32, #tpu.memory_space<vmem>>, %arg2: memref<3x384xf32, #tpu.memory_space<vmem>>, %arg3: memref<1x6x128xf32, #tpu.memory_space<vmem>>) attributes {dimension_semantics = [#tpu.dimension_semantics<parallel>], iteration_bounds = array<i64: 1>, scalar_prefetch = 0 : i64, scratch_operands = 0 : i64, tpu.core_type = #tpu.core_type<tc>, window_params = [{transform_indices = @transform_0, window_bounds = array<i64: 1, 6, 3>}, {pipeline_mode = #tpu.pipeline_mode<synchronous>, transform_indices = @transform_1, window_bounds = array<i64: 3, 384>}, {transform_indices = @transform_2, window_bounds = array<i64: 1, 6, 128>}]} {
    %c0 = arith.constant 0 : index
    %c0_0 = arith.constant 0 : index
    %0 = vector.load %arg2[%c0, %c0_0] : memref<3x384xf32, #tpu.memory_space<vmem>>, vector<3x384xf32>
    %c0_1 = arith.constant 0 : index
    %c0_2 = arith.constant 0 : index
    %c0_3 = arith.constant 0 : index
    %1 = vector.load %arg1[%c0_1, %c0_2, %c0_3] : memref<1x6x3xf32, #tpu.memory_space<vmem>>, vector<1x6x3xf32>
    %2 = vector.shape_cast %1 : vector<1x6x3xf32> to vector<6x3xf32>
    %cst = arith.constant dense<0.000000e+00> : vector<6x384xf32>
    %3 = tpu.matmul %2, %0, %cst {dimension_numbers = #tpu.dot_dimension_numbers<[1], [0], [0], [1], [0, 0, 1, 1], [], []>} : vector<6x3xf32>, vector<3x384xf32>, vector<6x384xf32> -> vector<6x384xf32>
    %4 = vector.extract_strided_slice %3 {offsets = [0, 0], sizes = [6, 128], strides = [1, 1]} : vector<6x384xf32> to vector<6x128xf32>
    %5 = vector.extract_strided_slice %3 {offsets = [0, 128], sizes = [6, 128], strides = [1, 1]} : vector<6x384xf32> to vector<6x128xf32>
    %6 = vector.extract_strided_slice %3 {offsets = [0, 256], sizes = [6, 128], strides = [1, 1]} : vector<6x384xf32> to vector<6x128xf32>
    %cst_4 = arith.constant dense<0.000000e+00> : vector<6x6xf32>
    %7 = tpu.matmul %4, %5, %cst_4 {dimension_numbers = #tpu.dot_dimension_numbers<[1], [1], [0], [0], [0, 0, 1, 0], [], []>} : vector<6x128xf32>, vector<6x128xf32>, vector<6x6xf32> -> vector<6x6xf32>
    %cst_5 = arith.constant dense<0xFF800000> : vector<6xf32>
    %8 = vector.multi_reduction <maximumf>, %7, %cst_5 [1] : vector<6x6xf32> to vector<6xf32>
    %9 = vector.shape_cast %8 : vector<6xf32> to vector<6x1xf32>
    %10 = vector.broadcast %9 : vector<6x1xf32> to vector<6x6xf32>
    %11 = arith.subf %7, %10 : vector<6x6xf32>
    %12 = math.exp %11 : vector<6x6xf32>
    %cst_6 = arith.constant dense<0.000000e+00> : vector<6xf32>
    %13 = vector.multi_reduction <add>, %12, %cst_6 [1] : vector<6x6xf32> to vector<6xf32>
    %14 = vector.shape_cast %13 : vector<6xf32> to vector<6x1xf32>
    %cst_7 = arith.constant dense<0.000000e+00> : vector<6x128xf32>
    %15 = tpu.matmul %12, %6, %cst_7 {dimension_numbers = #tpu.dot_dimension_numbers<[1], [0], [0], [1], [0, 0, 1, 1], [], []>} : vector<6x6xf32>, vector<6x128xf32>, vector<6x128xf32> -> vector<6x128xf32>
    %16 = tpu.reciprocal %14 {approx = true} : vector<6x1xf32> -> vector<6x1xf32>
    %17 = arith.mulf %14, %16 : vector<6x1xf32>
    %cst_8 = arith.constant 2.000000e+00 : f32
    %18 = vector.broadcast %cst_8 : f32 to vector<6x1xf32>
    %19 = arith.subf %18, %17 : vector<6x1xf32>
    %20 = arith.mulf %16, %19 : vector<6x1xf32>
    %21 = vector.broadcast %20 : vector<6x1xf32> to vector<6x128xf32>
    %22 = arith.mulf %15, %21 : vector<6x128xf32>
    %c0_9 = arith.constant 0 : index
    %c0_10 = arith.constant 0 : index
    %c0_11 = arith.constant 0 : index
    %23 = vector.load %arg3[%c0_9, %c0_10, %c0_11] : memref<1x6x128xf32, #tpu.memory_space<vmem>>, vector<1x6x128xf32>
    %24 = vector.shape_cast %23 : vector<1x6x128xf32> to vector<6x128xf32>
    %25 = vector.shape_cast %22 : vector<6x128xf32> to vector<1x6x128xf32>
    tpu.vector_store %arg3[%c0_9, %c0_10, %c0_11], %25 {strides = array<i32>} : memref<1x6x128xf32, #tpu.memory_space<vmem>>, vector<1x6x128xf32>,
    return
  }
  func.func @transform_0(%arg0: i32) -> (i32, i32, i32) {
    %c0_i32 = arith.constant 0 : i32
    %c0_i32_0 = arith.constant 0 : i32
    %c0_i32_1 = arith.constant 0 : i32
    return %arg0, %c0_i32, %c0_i32_0 : i32, i32, i32
  }
  func.func @transform_1(%arg0: i32) -> (i32, i32) {
    %c0_i32 = arith.constant 0 : i32
    %c0_i32_0 = arith.constant 0 : i32
    %c0_i32_1 = arith.constant 0 : i32
    return %c0_i32, %c0_i32_0 : i32, i32
  }
  func.func @transform_2(%arg0: i32) -> (i32, i32, i32) {
    %c0_i32 = arith.constant 0 : i32
    %c0_i32_0 = arith.constant 0 : i32
    %c0_i32_1 = arith.constant 0 : i32
    return %arg0, %c0_i32, %c0_i32_0 : i32, i32, i32
  }
}

</mosaic_0001>

<bundles_post_ra>
// kernel: tpu_custom_call.1
= control target key start
LH: loop header
LB: loop body
LE: loop exit
PB: predicated region body
PF: predicated region fallthrough
CT: control target
= control target key end

     0   :  { %vm21_vm0 = vcmask 1042432   ;;  %v372_v1 = vmov 0.0   ;;  %vm17_vm1 = vcmask 23552   ;;  %vm373_vm2 = vmmov 0   ;;  %s403_s1 = inlined_call_operand.vmem [shape: f32[3,384], index: 1, kind: input, shape index: {}]   ;;  %s404_s0 = inlined_call_operand.vmem [shape: f32[1,6,3], index: 0, kind: input, shape index: {}]   ;;  %s405_s2 = inlined_call_operand.vmem [shape: f32[1,6,128], index: 2, kind: output, shape index: {}]  }
   0x1   :  { %v11_v0 = vld [vmem:[%s403_s1] sm:$0x77]  ;;  %92 = vmatprep.mubr.f32.mxu0 %v372_v1  ;;  %350 = vmatprep.subr.mxu1 %v372_v1  ;;  %v12_v4 = vld [vmem:[%s403_s1 + $0x8] sm:$0x7]  ;;  %vm239_vm3 = vcmask 46080   ;;  %vm253_vm4 = vcmask 1045504  }
   0x2   :  { %v16_v2 = vcombine.high %v11_v0, %v11_v0  ;;  %v13_v3 = vld [vmem:[%s404_s0] sm:$0x3f]  ;;  %352 = vmatprep.mubr.msk.f32.mxu1 %vm373_vm2, %v372_v1  ;;  %351 = vmatpush3.msk.msra.mxu1 %vm21_vm0, %v12_v4  ;;  %vm249_vm5 = vcmask 48128  }
   0x3   :  { %353 = vmatmul.mubr.msk.f32.vlgmr.msra.gmra.mxu1 %vm17_vm1, %v13_v3  ;;  %360 = vmatprep.subr.mxu1 %v372_v1 }
   0x4   :  { %337 = vmatprep.subr.msk.mxu0 %vm21_vm0, %v16_v2  ;;  %362 = vmatprep.mubr.msk.f32.mxu1 %vm373_vm2, %v372_v1 }
   0x5   :  { %338 = vmatpush1.msk.msra.mxu0 %vm21_vm0, %v11_v0 }
   0x6   :  { %339 = vmatmul.mubr.msk.f32.vlgmr.msra.gmra.mxu0 %vm17_vm1, %v13_v3  ;;  %355 = vmatprep.subr.mxu0 %v372_v1 }
   0x7   :  { %357 = vmatprep.mubr.msk.f32.mxu0 %vm373_vm2, %v372_v1 }
  0xc3   :  { %v165_v10 = vpop.f32.mrf.mxu1 }
  0xc4   :  { %361 = vmatpush3.msk.msra.mxu1 %vm253_vm4, %v165_v10 }
  0xc5   :  { %v354_v11 = vpop.f32.mrf.mxu1 }
  0xc6   :  { %v94_v5 = vpop.f32.mrf.mxu0 }
  0xc8   :  { %v96_v6 = vpop.f32.mrf.mxu0 }
  0xc9   :  { %356 = vmatpush3.xpose.msra.mxu0 %v96_v6 }
  0xcc   :  { %358 = vmatmul.mubr.f32.vlgmr.msra.gmra.mxu0 %v94_v5 }
 0x18c   :  { %v235_v7 = vpop.f32.mrf.mxu0 }
 0x18d   :  { %v240_v8 = vsel %vm239_vm3, %v235_v7, -inf }
 0x18e   :  { %241 = vmax.xlane.f32.xlu0 %v240_v8  ;;  %v359_v9 = vpop.f32.mrf.mxu0 }
 0x217   :  { %v242_v12 = vpop.xlane.xlu0 %241 }
 0x218   :  { %v243_v13 = vsub.f32 %v235_v7, %v242_v12 }
 0x21a   :  { %v244_v14 = vmul.f32 1.442695, %v243_v13 }
 0x21c   :  { %368 = vpow2.f32 %v244_v14 }
 0x229   :  { %v369_v15 = vpop.eup %368 }
 0x22a   :  { %363 = vmatmul.mubr.msk.f32.vlgmr.msra.gmra.mxu1 %vm249_vm5, %v369_v15  ;;  %v246_v16 = vsel %vm239_vm3, %v369_v15, 0.0 }
 0x22b   :  { %247 = vadd.xlane.f32.xlu0 %v246_v16 }
 0x2b4   :  { %v248_v17 = vpop.xlane.xlu0 %247 }
 0x2b5   :  { %370 = vrcp.f32 %v248_v17 }
 0x2c2   :  { %v371_v18 = vpop.eup %370 }
 0x2c3   :  { %v328_v19 = vmul.f32 %v371_v18, %v248_v17 }
 0x2c5   :  { %v329_v20 = vsub.f32 2.0, %v328_v19 }
 0x2c7   :  { %v330_v21 = vmul.f32 %v371_v18, %v329_v20 }
 0x2ea   :  { %v323_v22 = vpop.f32.mrf.mxu1 }
 0x2eb   :  { %v331_v23 = vmul.f32 %v330_v21, %v323_v22 }
 0x2ec   :  { %v364_v24 = vpop.f32.mrf.mxu1 }
 0x2ed   :  { %332 = vst [vmem:[%s405_s2] sm:$0x3f] %v331_v23 }

// kernel: tpu_custom_call.1
= control target key start
LH: loop header
LB: loop body
LE: loop exit
PB: predicated region body
PF: predicated region fallthrough
CT: control target
= control target key end

     0   :  { %vm21_vm0 = vcmask 1042432   ;;  %v372_v1 = vmov 0.0   ;;  %vm17_vm1 = vcmask 23552   ;;  %vm373_vm2 = vmmov 0   ;;  %s403_s1 = inlined_call_operand.vmem [shape: f32[3,384], index: 1, kind: input, shape index: {}]   ;;  %s404_s0 = inlined_call_operand.vmem [shape: f32[1,6,3], index: 0, kind: input, shape index: {}]   ;;  %s405_s2 = inlined_call_operand.vmem [shape: f32[1,6,128], index: 2, kind: output, shape index: {}]  }
   0x1   :  { %v11_v0 = vld [vmem:[%s403_s1] sm:$0x77]  ;;  %92 = vmatprep.mubr.f32.mxu0 %v372_v1  ;;  %350 = vmatprep.subr.mxu1 %v372_v1  ;;  %v12_v4 = vld [vmem:[%s403_s1 + $0x8] sm:$0x7]  ;;  %vm239_vm3 = vcmask 46080   ;;  %vm253_vm4 = vcmask 1045504  }
   0x2   :  { %v16_v2 = vcombine.high %v11_v0, %v11_v0  ;;  %v13_v3 = vld [vmem:[%s404_s0] sm:$0x3f]  ;;  %352 = vmatprep.mubr.msk.f32.mxu1 %vm373_vm2, %v372_v1  ;;  %351 = vmatpush3.msk.msra.mxu1 %vm21_vm0, %v12_v4  ;;  %vm249_vm5 = vcmask 48128  }
   0x3   :  { %353 = vmatmul.mubr.msk.f32.vlgmr.msra.gmra.mxu1 %vm17_vm1, %v13_v3  ;;  %360 = vmatprep.subr.mxu1 %v372_v1 }
   0x4   :  { %337 = vmatprep.subr.msk.mxu0 %vm21_vm0, %v16_v2  ;;  %362 = vmatprep.mubr.msk.f32.mxu1 %vm373_vm2, %v372_v1 }
   0x5   :  { %338 = vmatpush1.msk.msra.mxu0 %vm21_vm0, %v11_v0 }
   0x6   :  { %339 = vmatmul.mubr.msk.f32.vlgmr.msra.gmra.mxu0 %vm17_vm1, %v13_v3  ;;  %355 = vmatprep.subr.mxu0 %v372_v1 }
   0x7   :  { %357 = vmatprep.mubr.msk.f32.mxu0 %vm373_vm2, %v372_v1 }
  0xc3   :  { %v165_v10 = vpop.f32.mrf.mxu1 }
  0xc4   :  { %361 = vmatpush3.msk.msra.mxu1 %vm253_vm4, %v165_v10 }
  0xc5   :  { %v354_v11 = vpop.f32.mrf.mxu1 }
  0xc6   :  { %v94_v5 = vpop.f32.mrf.mxu0 }
  0xc8   :  { %v96_v6 = vpop.f32.mrf.mxu0 }
  0xc9   :  { %356 = vmatpush3.xpose.msra.mxu0 %v96_v6 }
  0xcc   :  { %358 = vmatmul.mubr.f32.vlgmr.msra.gmra.mxu0 %v94_v5 }
 0x18c   :  { %v235_v7 = vpop.f32.mrf.mxu0 }
 0x18d   :  { %v240_v8 = vsel %vm239_vm3, %v235_v7, -inf }
 0x18e   :  { %241 = vmax.xlane.f32.xlu0 %v240_v8  ;;  %v359_v9 = vpop.f32.mrf.mxu0 }
 0x217   :  { %v242_v12 = vpop.xlane.xlu0 %241 }
 0x218   :  { %v243_v13 = vsub.f32 %v235_v7, %v242_v12 }
 0x21a   :  { %v244_v14 = vmul.f32 1.442695, %v243_v13 }
 0x21c   :  { %368 = vpow2.f32 %v244_v14 }
 0x229   :  { %v369_v15 = vpop.eup %368 }
 0x22a   :  { %363 = vmatmul.mubr.msk.f32.vlgmr.msra.gmra.mxu1 %vm249_vm5, %v369_v15  ;;  %v246_v16 = vsel %vm239_vm3, %v369_v15, 0.0 }
 0x22b   :  { %247 = vadd.xlane.f32.xlu0 %v246_v16 }
 0x2b4   :  { %v248_v17 = vpop.xlane.xlu0 %247 }
 0x2b5   :  { %370 = vrcp.f32 %v248_v17 }
 0x2c2   :  { %v371_v18 = vpop.eup %370 }
 0x2c3   :  { %v328_v19 = vmul.f32 %v371_v18, %v248_v17 }
 0x2c5   :  { %v329_v20 = vsub.f32 2.0, %v328_v19 }
 0x2c7   :  { %v330_v21 = vmul.f32 %v371_v18, %v329_v20 }
 0x2ea   :  { %v323_v22 = vpop.f32.mrf.mxu1 }
 0x2eb   :  { %v331_v23 = vmul.f32 %v330_v21, %v323_v22 }
 0x2ec   :  { %v364_v24 = vpop.f32.mrf.mxu1 }
 0x2ed   :  { %332 = vst [vmem:[%s405_s2] sm:$0x3f] %v331_v23 }

</bundles_post_ra>
